<compile_context>
chip_gen: v5e
topology: v5e:2x2
jax: 0.10.0
libtpu: 0.0.40
codegen_flags: <defaults>
</compile_context>

<pallas_src>
import functools

import jax
import jax.numpy as jnp
from jax.experimental import pallas as pl
from jax.experimental.pallas import tpu as pltpu

LANES = 128
SUBLANES = 8
TARGET_VMEM_BYTES = 8 * 1024 * 1024    # padded working-set budget (safe on v5e/v6e/v7x)
VMEM_LIMIT_BYTES = 32 * 1024 * 1024    # explicit scoped-VMEM limit (<= physical everywhere)


def _round_up(x, m):
    return (x + m - 1) // m * m


def _num_tensorcores():
    """2 TensorCores per JAX device on v7x; 1 on v5e/v6e (and as a safe fallback)."""
    try:
        kind = jax.devices()[0].device_kind.lower()
    except Exception:
        return 1
    return 2 if "v7" in kind else 1


def _dfl_kernel(n_valid_ref, col_ref, pred_ref, label_ref, out_ref, acc_ref, *,
                tile_n, num_cores):
    c_id = pl.program_id(0)        # "parallel" axis (2 TCs on v7x, size 1 elsewhere)
    step = pl.program_id(1)        # "arbitrary" reduction axis over sample blocks
    nsteps = pl.num_programs(1)

    @pl.when(step == 0)
    def _():
        acc_ref[...] = jnp.zeros_like(acc_ref)

    x = pred_ref[...].astype(jnp.float32)       # (C, TN) logits: classes on sublanes
    lab = label_ref[...]                        # (1, TN) continuous labels (f32)
    col = col_ref[...]                          # (C, 1)  float class indices (hoisted)

    # Stable log-sum-exp over the class (sublane) axis: one exp/elem, one log/sample.
    m = jnp.max(x, axis=0, keepdims=True)
    lse = m + jnp.log(jnp.sum(jnp.exp(x - m), axis=0, keepdims=True))

    # Tent weight: w[c, j] = max(0, 1 - |label_j - c|) == wl at disl, wr at disr, 0 else.
    w = jnp.maximum(0.0, 1.0 - jnp.abs(lab - col))          # (C, TN)
    gathered = jnp.sum(x * w, axis=0, keepdims=True)         # (1, TN)

    # Since wl + wr == 1:  CE(disl)*wl + CE(disr)*wr == lse - gathered.
    loss = lse - gathered                                    # (1, TN) lane-dense

    # Steady state: plain lane-dense vector accumulate (no masking, no reductions).
    @pl.when(step < nsteps - 1)
    def _():
        acc_ref[...] += loss

    # Final step per core: mask padded samples (only possible in this block because
    # sample blocks are interleaved across cores), reduce, emit this core's partial.
    @pl.when(step == nsteps - 1)
    def _():
        block_idx = step * num_cores + c_id
        lane = jax.lax.broadcasted_iota(jnp.int32, loss.shape, 1) + block_idx * tile_n
        acc_ref[...] += jnp.where(lane < n_valid_ref[0], loss, 0.0)
        out_ref[...] = jnp.broadcast_to(jnp.sum(acc_ref[...]), out_ref.shape)


def _dfl_partial_sums(pred, label):
    """Sum of per-sample distribution-focal losses (Pallas) plus the sample count."""
    n, c = pred.shape
    num_cores = _num_tensorcores()

    pred_t = jnp.transpose(pred, (1, 0))                     # (C, N) lane-dense samples
    label2 = label.astype(jnp.float32).reshape(1, n)
    col = jnp.arange(c, dtype=jnp.float32).reshape(c, 1)

    # Padded-VMEM accounting per sample column (f32):
    #   pred block  : round_up(C,8) * 4 bytes   x2 (double-buffered)
    #   label block : 8 * 4 bytes               x2
    #   acc scratch : 8 * 4 bytes
    c_sub = _round_up(c, SUBLANES)
    bytes_per_col = 4 * (2 * c_sub + 2 * SUBLANES + SUBLANES)
    budget_cols = max(LANES, (TARGET_VMEM_BYTES // bytes_per_col) // LANES * LANES)
    tile_n = min(_round_up(n, LANES), budget_cols)

    blocks = -(-n // tile_n)
    blocks_per_core = -(-blocks // num_cores)
    total_blocks = blocks_per_core * num_cores
    n_pad = total_blocks * tile_n
    if n_pad != n:
        pred_t = jnp.pad(pred_t, ((0, 0), (0, n_pad - n)))
        label2 = jnp.pad(label2, ((0, 0), (0, n_pad - n)))

    kernel = functools.partial(_dfl_kernel, tile_n=int(tile_n), num_cores=num_cores)

    # Interleaved block assignment: core cc handles blocks (step*num_cores + cc), so
    # padded samples are guaranteed to live only in each core's final block.
    out = pl.pallas_call(
        kernel,
        out_shape=jax.ShapeDtypeStruct((1, num_cores * LANES), jnp.float32),
        grid_spec=pltpu.PrefetchScalarGridSpec(
            num_scalar_prefetch=1,
            grid=(num_cores, blocks_per_core),
            in_specs=[
                pl.BlockSpec((c, 1), lambda cc, i, nv: (0, 0)),
                pl.BlockSpec((c, tile_n),
                             lambda cc, i, nv, nc=num_cores: (0, i * nc + cc)),
                pl.BlockSpec((1, tile_n),
                             lambda cc, i, nv, nc=num_cores: (0, i * nc + cc)),
            ],
            out_specs=pl.BlockSpec((1, LANES), lambda cc, i, nv: (0, cc)),
            scratch_shapes=[pltpu.VMEM((1, tile_n), jnp.float32)],
        ),
        compiler_params=pltpu.CompilerParams(
            dimension_semantics=("parallel", "arbitrary"),
            vmem_limit_bytes=VMEM_LIMIT_BYTES,
        ),
    )(jnp.array([n], dtype=jnp.int32), col, pred_t, label2)

    partials = out.reshape(num_cores, LANES)[:, 0]           # one valid lane per core
    return jnp.sum(partials), n


class DFocalLoss:
    """JAX/Pallas port of the PyTorch DFocalLoss module (forward pass only).

    Notes: labels are assumed non-negative and < C-1 (the DFL domain); the
    truncation disl = int(label) matches .long() only for non-negative labels.
    """

    def __init__(self, reduction='mean', loss_weight=1.0):
        self.reduction = reduction
        self.loss_weight = loss_weight

    def __call__(self, pred, target, weight=None, avg_factor=None,
                 reduction_override=None):
        assert reduction_override in (None, 'none', 'mean', 'sum')
        reduction = reduction_override if reduction_override else self.reduction
        if weight is not None or reduction == 'none':
            # TODO(synk): element-wise `weight` and reduction='none' need a
            # per-sample-output kernel variant; only mean/sum paths implemented.
            raise NotImplementedError("weight / reduction='none' not implemented")
        total, n = _dfl_partial_sums(pred, target)
        if avg_factor is None:
            loss = total / n if reduction == 'mean' else total
        elif reduction == 'mean':
            loss = total / avg_factor
        else:
            raise ValueError('avg_factor can not be used with reduction="sum"')
        return self.loss_weight * loss


def _reference_dfl(pred, label, loss_weight=1.0):
    """Pure-JAX reference mirroring the PyTorch distribution_focal_loss (mean)."""
    logp = jax.nn.log_softmax(pred.astype(jnp.float32), axis=-1)
    disl = label.astype(jnp.int32)
    disr = disl + 1
    wl = disr.astype(jnp.float32) - label
    wr = label - disl.astype(jnp.float32)
    ce_l = -jnp.take_along_axis(logp, disl[:, None], axis=-1)[:, 0]
    ce_r = -jnp.take_along_axis(logp, disr[:, None], axis=-1)[:, 0]
    return loss_weight * jnp.mean(ce_l * wl + ce_r * wr)


if __name__ == "__main__":
    key = jax.random.PRNGKey(0)
    k1, k2 = jax.random.split(key)

    # Small shapes consistent with DFL usage: N flattened box-side samples over
    # C = reg_max + 1 distribution bins, continuous targets in [0, C-1).
    N, C = 512, 17
    pred = jax.random.normal(k1, (N, C), dtype=jnp.float32)
    target = jax.random.uniform(k2, (N,), minval=0.0, maxval=float(C - 1) - 1e-3,
                                dtype=jnp.float32)

    loss_fn = DFocalLoss(reduction='mean', loss_weight=1.0)
    out = loss_fn(pred, target)
    out = jax.block_until_ready(out)

    ref = _reference_dfl(pred, target)
    assert jnp.allclose(out, ref, rtol=2e-5, atol=1e-6), (out, ref)
    print("KERNEL_OK")
</pallas_src>

<mosaic_0001>
module attributes {stable_mosaic.version = 11 : i64} {
  func.func @_dfl_kernel(%arg0: i32, %arg1: i32, %arg2: memref<1xi32, #tpu.memory_space<smem>>, %arg3: memref<17x1xf32, #tpu.memory_space<vmem>>, %arg4: memref<17x512xf32, #tpu.memory_space<vmem>>, %arg5: memref<1x512xf32, #tpu.memory_space<vmem>>, %arg6: memref<1x128xf32, #tpu.memory_space<vmem>>, %arg7: memref<1x512xf32, #tpu.memory_space<vmem>>) attributes {dimension_semantics = [#tpu.dimension_semantics<parallel>, #tpu.dimension_semantics<arbitrary>], iteration_bounds = array<i64: 1, 1>, scalar_prefetch = 1 : i64, scratch_operands = 1 : i64, tpu.core_type = #tpu.core_type<tc>, window_params = [{pipeline_mode = #tpu.pipeline_mode<synchronous>, transform_indices = @transform_0, window_bounds = array<i64: 17, 1>}, {transform_indices = @transform_1, window_bounds = array<i64: 17, 512>}, {transform_indices = @transform_2, window_bounds = array<i64: 1, 512>}, {transform_indices = @transform_3, window_bounds = array<i64: 1, 128>}]} {
    %c0_i32 = arith.constant 0 : i32
    %0 = arith.cmpi eq, %arg1, %c0_i32 : i32
    %1 = arith.extui %0 : i1 to i32
    %c0_i32_0 = arith.constant 0 : i32
    %2 = arith.cmpi ne, %1, %c0_i32_0 : i32
    scf.if %2 {
      %cst_14 = arith.constant 0.000000e+00 : f32
      %33 = vector.broadcast %cst_14 : f32 to vector<1x512xf32>
      %c0_15 = arith.constant 0 : index
      %c0_16 = arith.constant 0 : index
      %34 = vector.load %arg7[%c0_15, %c0_16] : memref<1x512xf32, #tpu.memory_space<vmem>>, vector<1x512xf32>
      tpu.vector_store %arg7[%c0_15, %c0_16], %33 {strides = array<i32>} : memref<1x512xf32, #tpu.memory_space<vmem>>, vector<1x512xf32>,
    } else {
    }
    %c0 = arith.constant 0 : index
    %c0_1 = arith.constant 0 : index
    %3 = vector.load %arg4[%c0, %c0_1] : memref<17x512xf32, #tpu.memory_space<vmem>>, vector<17x512xf32>
    %c0_2 = arith.constant 0 : index
    %c0_3 = arith.constant 0 : index
    %4 = vector.load %arg5[%c0_2, %c0_3] : memref<1x512xf32, #tpu.memory_space<vmem>>, vector<1x512xf32>
    %c0_4 = arith.constant 0 : index
    %c0_5 = arith.constant 0 : index
    %5 = vector.load %arg3[%c0_4, %c0_5] : memref<17x1xf32, #tpu.memory_space<vmem>>, vector<17x1xf32>
    %cst = arith.constant dense<0xFF800000> : vector<512xf32>
    %6 = vector.multi_reduction <maximumf>, %3, %cst [0] : vector<17x512xf32> to vector<512xf32>
    %7 = vector.shape_cast %6 : vector<512xf32> to vector<1x512xf32>
    %8 = vector.broadcast %7 : vector<1x512xf32> to vector<17x512xf32>
    %9 = arith.subf %3, %8 : vector<17x512xf32>
    %10 = math.exp %9 : vector<17x512xf32>
    %cst_6 = arith.constant dense<0.000000e+00> : vector<512xf32>
    %11 = vector.multi_reduction <add>, %10, %cst_6 [0] : vector<17x512xf32> to vector<512xf32>
    %12 = vector.shape_cast %11 : vector<512xf32> to vector<1x512xf32>
    %13 = math.log %12 : vector<1x512xf32>
    %14 = arith.addf %7, %13 : vector<1x512xf32>
    %15 = vector.broadcast %4 : vector<1x512xf32> to vector<17x512xf32>
    %16 = vector.broadcast %5 : vector<17x1xf32> to vector<17x512xf32>
    %17 = arith.subf %15, %16 : vector<17x512xf32>
    %18 = math.absf %17 : vector<17x512xf32>
    %cst_7 = arith.constant 1.000000e+00 : f32
    %19 = vector.broadcast %cst_7 : f32 to vector<17x512xf32>
    %20 = arith.subf %19, %18 : vector<17x512xf32>
    %cst_8 = arith.constant 0.000000e+00 : f32
    %21 = vector.broadcast %cst_8 : f32 to vector<17x512xf32>
    %22 = arith.maximumf %21, %20 : vector<17x512xf32>
    %23 = arith.mulf %3, %22 : vector<17x512xf32>
    %cst_9 = arith.constant dense<0.000000e+00> : vector<512xf32>
    %24 = vector.multi_reduction <add>, %23, %cst_9 [0] : vector<17x512xf32> to vector<512xf32>
    %25 = vector.shape_cast %24 : vector<512xf32> to vector<1x512xf32>
    %26 = arith.subf %14, %25 : vector<1x512xf32>
    %c0_i32_10 = arith.constant 0 : i32
    %27 = arith.cmpi slt, %arg1, %c0_i32_10 : i32
    %28 = arith.extui %27 : i1 to i32
    %c0_i32_11 = arith.constant 0 : i32
    %29 = arith.cmpi ne, %28, %c0_i32_11 : i32
    scf.if %29 {
      %c0_14 = arith.constant 0 : index
      %c0_15 = arith.constant 0 : index
      %33 = vector.load %arg7[%c0_14, %c0_15] : memref<1x512xf32, #tpu.memory_space<vmem>>, vector<1x512xf32>
      %34 = arith.addf %33, %26 : vector<1x512xf32>
      %c0_16 = arith.constant 0 : index
      %c0_17 = arith.constant 0 : index
      %35 = vector.load %arg7[%c0_16, %c0_17] : memref<1x512xf32, #tpu.memory_space<vmem>>, vector<1x512xf32>
      tpu.vector_store %arg7[%c0_16, %c0_17], %34 {strides = array<i32>} : memref<1x512xf32, #tpu.memory_space<vmem>>, vector<1x512xf32>,
    } else {
    }
    %c0_i32_12 = arith.constant 0 : i32
    %30 = arith.cmpi eq, %arg1, %c0_i32_12 : i32
    %31 = arith.extui %30 : i1 to i32
    %c0_i32_13 = arith.constant 0 : i32
    %32 = arith.cmpi ne, %31, %c0_i32_13 : i32
    scf.if %32 {
      %c1_i32 = arith.constant 1 : i32
      %33 = arith.muli %arg1, %c1_i32 : i32
      %34 = arith.addi %33, %arg0 : i32
      %35 = tpu.iota {dimensions = array<i32: 1>} : vector<1x512xi32>
      %c512_i32 = arith.constant 512 : i32
      %36 = arith.muli %34, %c512_i32 : i32
      %37 = vector.broadcast %36 : i32 to vector<1x512xi32>
      %38 = arith.addi %35, %37 : vector<1x512xi32>
      %c0_14 = arith.constant 0 : index
      %c0_15 = arith.constant 0 : index
      %39 = vector.load %arg7[%c0_14, %c0_15] : memref<1x512xf32, #tpu.memory_space<vmem>>, vector<1x512xf32>
      %c0_16 = arith.constant 0 : index
      %40 = memref.load %arg2[%c0_16] : memref<1xi32, #tpu.memory_space<smem>>
      %41 = vector.broadcast %40 : i32 to vector<1x512xi32>
      %42 = arith.cmpi slt, %38, %41 : vector<1x512xi32>
      %cst_17 = arith.constant 0.000000e+00 : f32
      %43 = vector.broadcast %cst_17 : f32 to vector<1x512xf32>
      %44 = arith.select %42, %26, %43 : vector<1x512xi1>, vector<1x512xf32>
      %45 = arith.addf %39, %44 : vector<1x512xf32>
      %c0_18 = arith.constant 0 : index
      %c0_19 = arith.constant 0 : index
      %46 = vector.load %arg7[%c0_18, %c0_19] : memref<1x512xf32, #tpu.memory_space<vmem>>, vector<1x512xf32>
      tpu.vector_store %arg7[%c0_18, %c0_19], %45 {strides = array<i32>} : memref<1x512xf32, #tpu.memory_space<vmem>>, vector<1x512xf32>,
      %c0_20 = arith.constant 0 : index
      %c0_21 = arith.constant 0 : index
      %47 = vector.load %arg7[%c0_20, %c0_21] : memref<1x512xf32, #tpu.memory_space<vmem>>, vector<1x512xf32>
      %48 = vector.shape_cast %47 : vector<1x512xf32> to vector<1x1x512xf32>
      %cst_22 = arith.constant dense<0.000000e+00> : vector<1xf32>
      %49 = vector.multi_reduction <add>, %48, %cst_22 [1, 2] : vector<1x1x512xf32> to vector<1xf32>
      %50 = vector.shape_cast %49 : vector<1xf32> to vector<1x1x1xf32>
      %51 = vector.extract %50[0, 0, 0] : f32 from vector<1x1x1xf32>
      %52 = vector.broadcast %51 : f32 to vector<1x128xf32>
      %c0_23 = arith.constant 0 : index
      %c0_24 = arith.constant 0 : index
      %53 = vector.load %arg6[%c0_23, %c0_24] : memref<1x128xf32, #tpu.memory_space<vmem>>, vector<1x128xf32>
      tpu.vector_store %arg6[%c0_23, %c0_24], %52 {strides = array<i32>} : memref<1x128xf32, #tpu.memory_space<vmem>>, vector<1x128xf32>,
    } else {
    }
    return
  }
  func.func @transform_0(%arg0: i32, %arg1: i32, %arg2: memref<1xi32, #tpu.memory_space<smem>>) -> (i32, i32) {
    %c0_i32 = arith.constant 0 : i32
    %c0_i32_0 = arith.constant 0 : i32
    %c0_i32_1 = arith.constant 0 : i32
    return %c0_i32, %c0_i32_0 : i32, i32
  }
  func.func @transform_1(%arg0: i32, %arg1: i32, %arg2: memref<1xi32, #tpu.memory_space<smem>>) -> (i32, i32) {
    %c1_i32 = arith.constant 1 : i32
    %0 = arith.muli %arg1, %c1_i32 : i32
    %1 = arith.addi %0, %arg0 : i32
    %c0_i32 = arith.constant 0 : i32
    %c0_i32_0 = arith.constant 0 : i32
    return %c0_i32, %1 : i32, i32
  }
  func.func @transform_2(%arg0: i32, %arg1: i32, %arg2: memref<1xi32, #tpu.memory_space<smem>>) -> (i32, i32) {
    %c1_i32 = arith.constant 1 : i32
    %0 = arith.muli %arg1, %c1_i32 : i32
    %1 = arith.addi %0, %arg0 : i32
    %c0_i32 = arith.constant 0 : i32
    %c0_i32_0 = arith.constant 0 : i32
    return %c0_i32, %1 : i32, i32
  }
  func.func @transform_3(%arg0: i32, %arg1: i32, %arg2: memref<1xi32, #tpu.memory_space<smem>>) -> (i32, i32) {
    %c0_i32 = arith.constant 0 : i32
    %c0_i32_0 = arith.constant 0 : i32
    return %c0_i32, %arg0 : i32, i32
  }
}

</mosaic_0001>

<bundles_post_ra>
// kernel: tpu_custom_call.1
= control target key start
LH: loop header
LB: loop body
LE: loop exit
PB: predicated region body
PF: predicated region fallthrough
CT: control target
= control target key end

     0   :  { %10 = vsyncpa [#allocation6], 0  ;;  %s702_s0 = inlined_call_operand.<no memory space> [shape: s32[1], index: 0, kind: input, shape index: {}]   ;;  %s703_s1 = inlined_call_operand.vmem [shape: f32[17,1], index: 1, kind: input, shape index: {}]   ;;  %s704_s2 = inlined_call_operand.hbm [shape: f32[17,512], index: 2, kind: input, shape index: {}]   ;;  %s705_s3 = inlined_call_operand.vmem [shape: f32[1,512], index: 3, kind: input, shape index: {}]   ;;  %s706_s4 = inlined_call_operand.hbm [shape: f32[1,128], index: 4, kind: output, shape index: {}]  }
   0x1   :  { %11 = vsyncpa [#allocation7], 0  ;;  %s22_s17 = sshll.u32 %s704_s2, 4  ;;  %s539_s18 = smov [#allocation5]   ;;  %s23_s17 = int_to_ptr.hbm [resolvable:$true] %s22_s17 }
   0x2   :  { %s24_s19 = sshll.u32 %s539_s18, 4  ;;  %s540_s20 = smov 512   ;;  %s25_s19 = int_to_ptr.vmem [resolvable:$true] %s24_s19 }
   0x3   :  { %s541_s21 = smov 32  }
   0x4   :  { %30 = dma.hbm_to_vmem [thread:$0]  %s23_s17, 1536, %s25_s19, [#allocation6], %s540_s20, %s540_s20, %s541_s21  }
   0x5   :  { %535 = dma.done.wait [#allocation6], 1536  }
   0x6   :  { %536 = vsyncadd [#allocation6], 4294965760  ;;  %v542_v0 = vmov 0   ;;  %v80_v1 = vld [vmem:[%s703_s1] sm:$0xff]  ;;  %v82_v2 = vld [vmem:[%s703_s1 + $0x10] sm:$0x1] }
   0x7   :  { %453 = vset.pattern.permute.xlu0 %v542_v0  ;;  %454 = vset.pattern.permute.xlu1 %v542_v0  ;;  %v81_v3 = vld [vmem:[%s703_s1 + $0x8] sm:$0xff]  ;;  %v586_v6 = vld [vmem:[#allocation5 + $0x10] sm:$0xff]  ;;  %v588_v7 = vld [vmem:[#allocation5 + $0x18] sm:$0xff]  ;;  %vm84_vm0 = vcmask 1040384   ;;  %vm386_vm6 = vcmask 1042434   ;;  %vm388_vm7 = vcmask 1041408  }
   0x8   :  { %215 = vperm.xlu0 %453, %v80_v1   ;;  %225 = vperm.xlu1 %454, %v82_v2   ;;  %v582_v4 = vld [vmem:[#allocation5] sm:$0xff]  ;;  %v584_v5 = vld [vmem:[#allocation5 + $0x8] sm:$0xff]  ;;  %v594_v10 = vld [vmem:[#allocation5 + $0x30] sm:$0xff]  ;;  %s432_s6 = sshll.u32 %s706_s4, 4  ;;  %s433_s6 = int_to_ptr.hbm [resolvable:$true] %s432_s6 }
   0x9   :  { %v590_v8 = vld [vmem:[#allocation5 + $0x20] sm:$0xff]  ;;  %v592_v9 = vld [vmem:[#allocation5 + $0x28] sm:$0xff]  ;;  %v596_v11 = vld [vmem:[#allocation5 + $0x38] sm:$0xff]  ;;  %v102_v18 = vmax.f32 %v586_v6, %v594_v10 }
   0xa   :  { %v598_v12 = vld [vmem:[#allocation5 + $0x40] sm:$0x1]  ;;  %v83_v13 = vmax.f32 %v582_v4, %v590_v8  ;;  %v93_v14 = vmax.f32 %v584_v5, %v592_v9  ;;  %v604_v15 = vld [vmem:[#allocation5 + $0x48] sm:$0x1]  ;;  %v606_v16 = vld [vmem:[#allocation5 + $0x50] sm:$0x1]  ;;  %v111_v19 = vmax.f32 %v588_v7, %v596_v11 }
   0xb   :  { %v608_v17 = vld [vmem:[#allocation5 + $0x58] sm:$0x1]  ;;  %v85_v20 = vsel %vm84_vm0, %v598_v12, -inf  ;;  %v94_v21 = vsel %vm84_vm0, %v604_v15, -inf  ;;  %v103_v22 = vsel %vm84_vm0, %v606_v16, -inf }
   0xc   :  { %v112_v23 = vsel %vm84_vm0, %v608_v17, -inf  ;;  %v86_v24 = vmax.f32 %v83_v13, %v85_v20  ;;  %v95_v25 = vmax.f32 %v93_v14, %v94_v21  ;;  %v104_v26 = vmax.f32 %v102_v18, %v103_v22 }
   0xd   :  { %v113_v27 = vmax.f32 %v111_v19, %v112_v23 }
   0xe   :  { %v87_v28 = vrot.slane %v86_v24, 4  ;;  %v96_v29 = vrot.slane %v95_v25, 4  ;;  %v105_v30 = vrot.slane %v104_v26, 4 }
   0xf   :  { %v114_v31 = vrot.slane %v113_v27, 4 }
  0x10   :  { %220 = vperm.xlu0 %453, %v81_v3   ;;  %v88_v32 = vmax.f32 %v86_v24, %v87_v28  ;;  %v97_v33 = vmax.f32 %v95_v25, %v96_v29  ;;  %v106_v34 = vmax.f32 %v104_v26, %v105_v30 }
  0x11   :  { %v115_v35 = vmax.f32 %v113_v27, %v114_v31 }
  0x12   :  { %v89_v36 = vrot.slane %v88_v32, 2  ;;  %v98_v37 = vrot.slane %v97_v33, 2  ;;  %v107_v38 = vrot.slane %v106_v34, 2 }
  0x13   :  { %v116_v39 = vrot.slane %v115_v35, 2 }
  0x14   :  { %v90_v40 = vmax.f32 %v88_v32, %v89_v36  ;;  %v99_v41 = vmax.f32 %v97_v33, %v98_v37  ;;  %v108_v42 = vmax.f32 %v106_v34, %v107_v38 }
  0x15   :  { %v117_v43 = vmax.f32 %v115_v35, %v116_v39  ;;  %v62_v39 = vlaneseq }
  0x16   :  { %v91_v44 = vrot.slane %v90_v40, 1  ;;  %v100_v45 = vrot.slane %v99_v41, 1  ;;  %v109_v46 = vrot.slane %v108_v42, 1 }
  0x17   :  { %v118_v47 = vrot.slane %v117_v43, 1  ;;  %vm658_vm1 = vcmp.lt.s32.totalorder %v62_v39, 512 }
  0x18   :  { %v622_v48 = vmax.f32 %v90_v40, %v91_v44  ;;  %v624_v49 = vmax.f32 %v99_v41, %v100_v45  ;;  %v626_v50 = vmax.f32 %v108_v42, %v109_v46 }
  0x19   :  { %v628_v51 = vmax.f32 %v117_v43, %v118_v47 }
  0x1a   :  { %v120_v52 = vsub.f32 %v582_v4, %v622_v48  ;;  %v121_v53 = vsub.f32 %v584_v5, %v624_v49  ;;  %v122_v54 = vsub.f32 %v586_v6, %v626_v50  ;;  %v124_v56 = vsub.f32 %v590_v8, %v622_v48 }
  0x1b   :  { %v123_v55 = vsub.f32 %v588_v7, %v628_v51  ;;  %v125_v57 = vsub.f32 %v592_v9, %v624_v49  ;;  %v126_v58 = vsub.f32 %v594_v10, %v626_v50  ;;  %v127_v62 = vsub.f32 %v596_v11, %v628_v51 }
  0x1c   :  { %v132_v59 = vmul.f32 1.442695, %v120_v52  ;;  %v134_v60 = vmul.f32 1.442695, %v121_v53  ;;  %v136_v61 = vmul.f32 1.442695, %v122_v54  ;;  %v128_v0 = vsub.f32 %v598_v12, %v622_v48 }
  0x1d   :  { %v138_v63 = vmul.f32 1.442695, %v123_v55  ;;  %v140_v1 = vmul.f32 1.442695, %v124_v56  ;;  %v129_v2 = vsub.f32 %v604_v15, %v624_v49  ;;  %v142_v3 = vmul.f32 1.442695, %v125_v57 }
  0x1e   :  { %455 = vpow2.f32 %v132_v59  ;;  %v130_v13 = vsub.f32 %v606_v16, %v626_v50  ;;  %v144_v14 = vmul.f32 1.442695, %v126_v58  ;;  %v131_v18 = vsub.f32 %v608_v17, %v628_v51  ;;  %v79_v57 = vld [vmem:[%s705_s3] sm:$0xf] }
  0x1f   :  { %457 = vpow2.f32 %v134_v60  ;;  %v146_v19 = vmul.f32 1.442695, %v127_v62  ;;  %v148_v20 = vmul.f32 1.442695, %v128_v0  ;;  %v150_v21 = vmul.f32 1.442695, %v129_v2 }
  0x20   :  { %459 = vpow2.f32 %v136_v61  ;;  %v152_v23 = vmul.f32 1.442695, %v130_v13  ;;  %v154_v25 = vmul.f32 1.442695, %v131_v18  ;;  %v543_v54 = vmov 0.0  }
  0x21   :  { %461 = vpow2.f32 %v138_v63  ;;  %66 = vst.msk [vmem:[#allocation2] sm:$0xf] %vm658_vm1, %v543_v54  ;;  %v205_v0 = vperm.slane %v79_v57, 0  ;;  %v207_v13 = vperm.slane %v79_v57, 2 }
  0x22   :  { %463 = vpow2.f32 %v140_v1  ;;  %v206_v1 = vperm.slane %v79_v57, 1 }
  0x23   :  { %465 = vpow2.f32 %v142_v3 }
  0x24   :  { %v456_v22 = vpop.eup %455  ;;  %467 = vpow2.f32 %v144_v14  ;;  %v208_v14 = vperm.slane %v79_v57, 3 }
  0x25   :  { %v458_v24 = vpop.eup %457  ;;  %469 = vpow2.f32 %v146_v19 }
  0x26   :  { %v460_v26 = vpop.eup %459  ;;  %471 = vpow2.f32 %v148_v20 }
  0x27   :  { %v462_v27 = vpop.eup %461  ;;  %473 = vpow2.f32 %v150_v21 }
  0x28   :  { %v464_v28 = vpop.eup %463  ;;  %475 = vpow2.f32 %v152_v23 }
  0x29   :  { %v466_v29 = vpop.eup %465  ;;  %477 = vpow2.f32 %v154_v25  ;;  %v156_v31 = vadd.f32 %v464_v28, %v456_v22 }
  0x2a   :  { %v468_v30 = vpop.eup %467  ;;  %v165_v33 = vadd.f32 %v466_v29, %v458_v24 }
  0x2b   :  { %v470_v32 = vpop.eup %469  ;;  %v174_v35 = vadd.f32 %v468_v30, %v460_v26 }
  0x2c   :  { %v472_v34 = vpop.eup %471  ;;  %v183_v38 = vadd.f32 %v470_v32, %v462_v27 }
  0x2d   :  { %v474_v36 = vpop.eup %473  ;;  %v157_v37 = vsel %vm84_vm0, %v472_v34, 0.0 }
  0x2e   :  { %v476_v40 = vpop.eup %475  ;;  %v158_v41 = vadd.f32 %v157_v37, %v156_v31  ;;  %v166_v42 = vsel %vm84_vm0, %v474_v36, 0.0 }
  0x2f   :  { %v478_v43 = vpop.eup %477  ;;  %v167_v44 = vadd.f32 %v166_v42, %v165_v33  ;;  %v175_v45 = vsel %vm84_vm0, %v476_v40, 0.0 }
  0x30   :  { %v159_v47 = vrot.slane %v158_v41, 4  ;;  %v176_v52 = vadd.f32 %v175_v45, %v174_v35  ;;  %v184_v53 = vsel %vm84_vm0, %v478_v43, 0.0 }
  0x31   :  { %v168_v55 = vrot.slane %v167_v44, 4  ;;  %v185_v56 = vadd.f32 %v184_v53, %v183_v38 }
  0x32   :  { %v160_v58 = vadd.f32 %v159_v47, %v158_v41  ;;  %v177_v59 = vrot.slane %v176_v52, 4 }
  0x33   :  { %v169_v60 = vadd.f32 %v168_v55, %v167_v44  ;;  %v186_v61 = vrot.slane %v185_v56, 4 }
  0x34   :  { %v161_v62 = vrot.slane %v160_v58, 2  ;;  %v178_v63 = vadd.f32 %v177_v59, %v176_v52 }
  0x35   :  { %v170_v2 = vrot.slane %v169_v60, 2  ;;  %v187_v3 = vadd.f32 %v186_v61, %v185_v56 }
  0x36   :  { %v162_v18 = vadd.f32 %v161_v62, %v160_v58  ;;  %v179_v19 = vrot.slane %v178_v63, 2 }
  0x37   :  { %v171_v20 = vadd.f32 %v170_v2, %v169_v60  ;;  %v188_v21 = vrot.slane %v187_v3, 2 }
  0x38   :  { %v163_v23 = vrot.slane %v162_v18, 1  ;;  %v180_v24 = vadd.f32 %v179_v19, %v178_v63 }
  0x39   :  { %v189_v25 = vadd.f32 %v188_v21, %v187_v3  ;;  %v172_v30 = vrot.slane %v171_v20, 1 }
  0x3a   :  { %v181_v35 = vrot.slane %v180_v24, 1  ;;  %v164_v38 = vadd.f32 %v163_v23, %v162_v18 }
  0x3b   :  { %v190_v36 = vrot.slane %v189_v25, 1  ;;  %v173_v43 = vadd.f32 %v172_v30, %v171_v20 }
  0x3c   :  { %v182_v52 = vadd.f32 %v181_v35, %v180_v24  ;;  %479 = vlog2.f32 %v164_v38 }
  0x3d   :  { %v191_v53 = vadd.f32 %v190_v36, %v189_v25  ;;  %481 = vlog2.f32 %v173_v43 }
  0x3e   :  { %483 = vlog2.f32 %v182_v52 }
  0x3f   :  { %485 = vlog2.f32 %v191_v53 }
  0x42   :  { %v480_v24 = vpop.eup %479 }
  0x7a   :  { %v216_v22 = vpop.permute.xlu0 %215  ;;  %v226_v37 = vpop.permute.xlu1 %225 }
  0x7b   :  { %v228_v26 = vsub.f32 %v205_v0, %v216_v22  ;;  %v229_v27 = vsub.f32 %v206_v1, %v216_v22  ;;  %v230_v28 = vsub.f32 %v207_v13, %v216_v22  ;;  %v231_v29 = vsub.f32 %v208_v14, %v216_v22 }
  0x7c   :  { %v236_v44 = vsub.f32 %v205_v0, %v226_v37  ;;  %v237_v56 = vsub.f32 %v206_v1, %v226_v37  ;;  %v238_v57 = vsub.f32 %v207_v13, %v226_v37  ;;  %v239_v2 = vsub.f32 %v208_v14, %v226_v37  ;;  %v482_v37 = vpop.eup %481 }
  0x7d   :  { %v240_v31 = vand.u32 2147483647, %v228_v26  ;;  %v241_v32 = vand.u32 2147483647, %v229_v27  ;;  %v242_v33 = vand.u32 2147483647, %v230_v28 }
  0x7e   :  { %v243_v34 = vand.u32 2147483647, %v231_v29  ;;  %v248_v3 = vand.u32 2147483647, %v236_v44  ;;  %v249_v22 = vand.u32 2147483647, %v237_v56 }
  0x7f   :  { %v252_v40 = vsub.f32 1.0, %v240_v31  ;;  %v253_v41 = vsub.f32 1.0, %v241_v32  ;;  %v254_v42 = vsub.f32 1.0, %v242_v33  ;;  %v250_v23 = vand.u32 2147483647, %v238_v57 }
  0x80   :  { %v255_v45 = vsub.f32 1.0, %v243_v34  ;;  %v260_v34 = vsub.f32 1.0, %v248_v3  ;;  %v261_v35 = vsub.f32 1.0, %v249_v22 }
  0x81   :  { %v264_v54 = vmax.f32 %v252_v40, 0.0  ;;  %v265_v58 = vmax.f32 %v253_v41, 0.0  ;;  %v266_v62 = vmax.f32 %v254_v42, 0.0  ;;  %v262_v36 = vsub.f32 1.0, %v250_v23  ;;  %v484_v41 = vpop.eup %483 }
  0x82   :  { %v221_v47 = vpop.permute.xlu0 %220  ;;  %v273_v43 = vmax.f32 %v261_v35, 0.0  ;;  %v197_v22 = vmul.f32 0.6931472, %v484_v41 }
  0x83   :  { %v232_v55 = vsub.f32 %v205_v0, %v221_v47  ;;  %v233_v59 = vsub.f32 %v206_v1, %v221_v47  ;;  %v234_v60 = vsub.f32 %v207_v13, %v221_v47  ;;  %v235_v61 = vsub.f32 %v208_v14, %v221_v47 }
  0x84   :  { %v267_v0 = vmax.f32 %v255_v45, 0.0  ;;  %v276_v1 = vmul.f32 %v264_v54, %v582_v4  ;;  %v277_v13 = vmul.f32 %v265_v58, %v584_v5  ;;  %v251_v14 = vand.u32 2147483647, %v239_v2  ;;  %v486_v2 = vpop.eup %485 }
  0x85   :  { %v244_v63 = vand.u32 2147483647, %v232_v55  ;;  %v245_v18 = vand.u32 2147483647, %v233_v59  ;;  %v246_v19 = vand.u32 2147483647, %v234_v60  ;;  %v278_v29 = vmul.f32 %v266_v62, %v586_v6 }
  0x86   :  { %v247_v20 = vand.u32 2147483647, %v235_v61  ;;  %v263_v5 = vsub.f32 1.0, %v251_v14  ;;  %v279_v42 = vmul.f32 %v267_v0, %v588_v7  ;;  %v272_v6 = vmax.f32 %v260_v34, 0.0 }
  0x87   :  { %v256_v21 = vsub.f32 1.0, %v244_v63  ;;  %v257_v25 = vsub.f32 1.0, %v245_v18  ;;  %v258_v26 = vsub.f32 1.0, %v246_v19  ;;  %v274_v44 = vmax.f32 %v262_v36, 0.0 }
  0x88   :  { %v259_v27 = vsub.f32 1.0, %v247_v20  ;;  %v275_v52 = vmax.f32 %v263_v5, 0.0  ;;  %v284_v55 = vmul.f32 %v272_v6, %v598_v12  ;;  %v193_v19 = vmul.f32 0.6931472, %v480_v24 }
  0x89   :  { %v268_v28 = vmax.f32 %v256_v21, 0.0  ;;  %v269_v30 = vmax.f32 %v257_v25, 0.0  ;;  %v270_v31 = vmax.f32 %v258_v26, 0.0  ;;  %v195_v20 = vmul.f32 0.6931472, %v482_v37 }
  0x8a   :  { %v271_v32 = vmax.f32 %v259_v27, 0.0  ;;  %v289_v56 = vsel %vm84_vm0, %v284_v55, 0.0  ;;  %v369_v27 = vstv %s702_s0  ;;  %v200_v24 = vadd.f32 %v193_v19, %v622_v48  ;;  %s544_s0 = smov [#allocation8]  }
  0x8b   :  { %v280_v33 = vmul.f32 %v268_v28, %v590_v8  ;;  %v281_v38 = vmul.f32 %v269_v30, %v592_v9  ;;  %v282_v40 = vmul.f32 %v270_v31, %v594_v10  ;;  %v285_v9 = vmul.f32 %v273_v43, %v604_v15  ;;  %s430_s29 = sshll.u32 %s544_s0, 4  ;;  %s431_s29 = int_to_ptr.vmem [resolvable:$true] %s430_s29 }
  0x8c   :  { %v283_v4 = vmul.f32 %v271_v32, %v596_v11  ;;  %v286_v10 = vmul.f32 %v274_v44, %v606_v16  ;;  %v287_v11 = vmul.f32 %v275_v52, %v608_v17  ;;  %v357_v16 = vand.u32 127, %v62_v39  ;;  %v367_v52 = vld [vmem:[#allocation2] sm:$0xf] }
  0x8d   :  { %v288_v45 = vadd.f32 %v280_v33, %v276_v1  ;;  %v297_v47 = vadd.f32 %v281_v38, %v277_v13  ;;  %v306_v8 = vadd.f32 %v282_v40, %v278_v29  ;;  %v298_v7 = vsel %vm84_vm0, %v285_v9, 0.0 }
  0x8e   :  { %v315_v54 = vadd.f32 %v283_v4, %v279_v42  ;;  %v307_v57 = vsel %vm84_vm0, %v286_v10, 0.0  ;;  %v316_v61 = vsel %vm84_vm0, %v287_v11, 0.0  ;;  %v358_v26 = vadd.s32 128, %v357_v16 }
  0x8f   :  { %v290_v58 = vadd.f32 %v289_v56, %v288_v45  ;;  %v299_v59 = vadd.f32 %v298_v7, %v297_v47  ;;  %v308_v60 = vadd.f32 %v307_v57, %v306_v8  ;;  %v199_v1 = vmul.f32 0.6931472, %v486_v2 }
  0x90   :  { %v317_v62 = vadd.f32 %v316_v61, %v315_v54  ;;  %v359_v39 = vadd.s32 256, %v357_v16  ;;  %v360_v30 = vadd.s32 384, %v357_v16  ;;  %v201_v31 = vadd.f32 %v195_v20, %v624_v49 }
  0x91   :  { %v291_v12 = vrot.slane %v290_v58, 4  ;;  %v300_v63 = vrot.slane %v299_v59, 4  ;;  %v309_v15 = vrot.slane %v308_v60, 4  ;;  %v202_v33 = vadd.f32 %v197_v22, %v626_v50 }
  0x92   :  { %v318_v53 = vrot.slane %v317_v62, 4  ;;  %v203_v37 = vadd.f32 %v199_v1, %v628_v51  ;;  %vm371_vm2 = vcmp.lt.s32.totalorder %v358_v26, %v369_v27  ;;  %vm372_vm3 = vcmp.lt.s32.totalorder %v359_v39, %v369_v27 }
  0x93   :  { %v292_v17 = vadd.f32 %v291_v12, %v290_v58  ;;  %v301_v3 = vadd.f32 %v300_v63, %v299_v59  ;;  %v310_v18 = vadd.f32 %v309_v15, %v308_v60  ;;  %vm373_vm4 = vcmp.lt.s32.totalorder %v360_v30, %v369_v27 }
  0x94   :  { %v319_v21 = vadd.f32 %v318_v53, %v317_v62  ;;  %vm370_vm5 = vcmp.lt.s32.totalorder %v357_v16, %v369_v27 }
  0x95   :  { %v293_v23 = vrot.slane %v292_v17, 2  ;;  %v302_v0 = vrot.slane %v301_v3, 2  ;;  %v311_v25 = vrot.slane %v310_v18, 2 }
  0x96   :  { %v320_v13 = vrot.slane %v319_v21, 2 }
  0x97   :  { %v294_v28 = vadd.f32 %v293_v23, %v292_v17  ;;  %v303_v14 = vadd.f32 %v302_v0, %v301_v3  ;;  %v312_v29 = vadd.f32 %v311_v25, %v310_v18 }
  0x98   :  { %v321_v32 = vadd.f32 %v320_v13, %v319_v21 }
  0x99   :  { %v295_v34 = vrot.slane %v294_v28, 1  ;;  %v304_v35 = vrot.slane %v303_v14, 1  ;;  %v313_v36 = vrot.slane %v312_v29, 1 }
  0x9a   :  { %v322_v38 = vrot.slane %v321_v32, 1 }
  0x9b   :  { %v296_v40 = vadd.f32 %v295_v34, %v294_v28  ;;  %v305_v4 = vadd.f32 %v304_v35, %v303_v14  ;;  %v314_v5 = vadd.f32 %v313_v36, %v312_v29 }
  0x9c   :  { %v323_v41 = vadd.f32 %v322_v38, %v321_v32 }
  0x9d   :  { %v324_v42 = vsub.f32 %v200_v24, %v296_v40  ;;  %v325_v48 = vsub.f32 %v201_v31, %v305_v4  ;;  %v326_v6 = vsub.f32 %v202_v33, %v314_v5 }
  0x9e   :  { %v327_v49 = vsub.f32 %v203_v37, %v323_v41 }
  0x9f   :  { %v375_v43 = vsel %vm371_vm2, %v325_v48, 0.0  ;;  %v376_v50 = vsel %vm372_vm3, %v326_v6, 0.0  ;;  %v374_v51 = vsel %vm370_vm5, %v324_v42, 0.0 }
  0xa0   :  { %v377_v44 = vsel %vm373_vm4, %v327_v49, 0.0  ;;  %v382_v45 = vrot.slane %v375_v43, 7  ;;  %v383_v47 = vrot.slane %v376_v50, 6 }
  0xa1   :  { %v384_v8 = vrot.slane %v377_v44, 5 }
  0xa2   :  { %v385_v54 = vsel %vm84_vm0, %v374_v51, %v382_v45 }
  0xa3   :  { %v387_v55 = vsel %vm386_vm6, %v383_v47, %v384_v8 }
  0xa4   :  { %v389_v9 = vsel %vm388_vm7, %v385_v54, %v387_v55 }
  0xa5   :  { %v391_v10 = vadd.f32 %v389_v9, %v367_v52 }
  0xa7   :  { %396 = vst.msk [vmem:[#allocation2] sm:$0xf] %vm658_vm1, %v391_v10 }
  0xae   :  { %v397_v11 = vld [vmem:[#allocation2] sm:$0xf] }
  0xaf   :  { %v399_v56 = vperm.slane %v397_v11, 0  ;;  %v400_v7 = vperm.slane %v397_v11, 1  ;;  %v401_v57 = vperm.slane %v397_v11, 2  ;;  %v402_v58 = vperm.slane %v397_v11, 3 }
  0xb1   :  { %v407_v59 = vsel %vm84_vm0, %v399_v56, 0.0  ;;  %v408_v60 = vsel %vm84_vm0, %v400_v7, 0.0  ;;  %v410_v62 = vsel %vm84_vm0, %v401_v57, 0.0  ;;  %v412_v63 = vsel %vm84_vm0, %v402_v58, 0.0 }
  0xb2   :  { %v409_v61 = vadd.f32 %v408_v60, %v407_v59 }
  0xb4   :  { %v411_v12 = vadd.f32 %v410_v62, %v409_v61 }
  0xb6   :  { %v413_v15 = vadd.f32 %v412_v63, %v411_v12 }
  0xb8   :  { %414 = vadd.xlane.f32.xlu1 %v413_v15 }
 0x12b   :  { %v415_v16 = vpop.xlane.xlu1 %414 }
 0x12c   :  { %v416_v46 = vrot.slane %v415_v16, 4 }
 0x12e   :  { %v417_v53 = vadd.f32 %v416_v46, %v415_v16 }
 0x130   :  { %v418_v2 = vrot.slane %v417_v53, 2 }
 0x132   :  { %v419_v17 = vadd.f32 %v418_v2, %v417_v53 }
 0x134   :  { %v420_v3 = vrot.slane %v419_v17, 1 }
 0x136   :  { %v421_v18 = vadd.f32 %v420_v3, %v419_v17 }
 0x138   :  { %445 = vpush %v421_v18 }
 0x169   :  { %s446_s7 = spop %445 }
 0x16a   :  { %v423_v19 = vstv %s446_s7 }
 0x16b   :  { %424 = vst [vmem:[#allocation8] sm:$0x1] %v423_v19 }
 0x16c   :  { %435 = dma.vmem_to_hbm [thread:$0]  %s431_s29, 16, %s433_s6, [#allocation7]  }
 0x16d   :  { %537 = dma.done.wait [#allocation7], 16  }
 0x16e   :  { %538 = vsyncadd [#allocation7], 4294967280 }
 0x16f   :  { %440 = vsyncpa [#allocation6], 1 }
 0x170   :  { %441 = vsyncpa [#allocation7], 1 }

</bundles_post_ra>
